<compile_context>
chip_gen: v5e
topology: v5e:2x2
jax: 0.10.0
libtpu: 0.0.40
codegen_flags: <defaults>
</compile_context>

<pallas_src>
import jax
import jax.numpy as jnp
from jax import lax
from jax.experimental import pallas as pl
from jax.experimental.pallas import tpu as pltpu
import numpy as np

# ---- static configuration (small, consistent with the module) --------------
N = 8              # batch (num envs)
GOAL_DIM = 3       # observation_space['pointgoal'].shape[0]
ACT_EMB = 32       # prev_action_embedding dim
EMB_ROWS = 5       # nn.Embedding(5, 32): valid prev actions are 0..3 so that
                   # idx = (a + 1) * mask stays in [0, 5)  (same range as spec)
HIDDEN = 128       # hidden_size
NUM_LAYERS = 2     # num_recurrent_layers
RNN_IN = 32 + ACT_EMB   # tgt_embed(32) + prev_action(32)  (blind => no cnn feats)
G3 = 3 * HIDDEN    # 384 (r|z|n gate width)

# packed (N, 8) input tile: lanes [0,3)=goal, lane 3=prev_action, lane 4=mask
PACK = GOAL_DIM + EMB_ROWS      # 8
COL_PA = GOAL_DIM               # 3
COL_MASK = GOAL_DIM + 1         # 4

# ---- small-slab row layout (one (16, 384) f32 tile) -------------------------
ROW_WG = 0                        # 3 rows : folded goal weights
ROW_WEMB = ROW_WG + GOAL_DIM      # 5 rows : folded prev-action embedding
ROW_B0 = ROW_WEMB + EMB_ROWS      # 1 row  : folded layer-0 input bias
ROW_BHH0 = ROW_B0 + 1             # 1 row  : b_hh layer 0
ROW_BIH1 = ROW_BHH0 + 1           # 1 row  : b_ih layer 1
ROW_BHH1 = ROW_BIH1 + 1           # 1 row  : b_hh layer 1
ROW_WC = ROW_BHH1 + 1             # 1 row  : critic weights in lanes [0, HIDDEN)
ROW_BC = ROW_WC + 1               # 1 row  : critic bias in lane 0
SMALL_ROWS = 16                   # padded to a multiple of 8 sublanes


# ---- fused Pallas kernel: packed input + folded embeds + 2-layer GRU + critic
def net_kernel(in8_ref, h_ref, wbig_ref, small_ref, value_ref, hout_ref):
    H = HIDDEN
    in8 = in8_ref[...]                                      # (N, 8) f32 packed
    mask = in8[:, COL_MASK:COL_MASK + 1]                    # (N, 1)
    masks_h = jnp.broadcast_to(mask, (N, H))                # hoisted broadcast
    # read both (masked) hidden slices up front (safe w.r.t. in/out aliasing)
    h0 = h_ref[0] * masks_h
    h1 = h_ref[1] * masks_h

    # prev-action index: idx = ((a + 1) * mask).long()   (valid actions 0..3)
    # NOTE: an out-of-range action (idx >= 5) silently yields a zero embedding
    # here, whereas torch.nn.Embedding(5, 32) would raise.
    idx = ((in8[:, COL_PA:COL_PA + 1] + 1.0) * mask).astype(jnp.int32)     # (N,1)
    lane = lax.broadcasted_iota(jnp.int32, (N, PACK), 1)                   # (N,8)
    onehot8 = (lane - GOAL_DIM == idx).astype(jnp.float32)                 # (N,8)
    # fused activation: lanes [0,3) = goal, lanes [3,8) = one-hot(idx)
    act8 = jnp.where(lane < GOAL_DIM, in8, onehot8)

    # ---- layer-0 input gates: one (N,8) x (8,3H) dot over [wg_f ; wemb_f] ----
    gi0 = jnp.dot(act8, small_ref[ROW_WG:ROW_WG + PACK, :],
                  preferred_element_type=jnp.float32) \
        + small_ref[ROW_B0:ROW_B0 + 1, :]

    # ---- GRU layer 0 (PyTorch gate order r, z, n) ----------------------------
    # bf16 weights fed straight to the MXU; activations cast to bf16, f32 accum.
    gh0 = jnp.dot(h0.astype(jnp.bfloat16), wbig_ref[0:H, :],
                  preferred_element_type=jnp.float32) \
        + small_ref[ROW_BHH0:ROW_BHH0 + 1, :]
    r0 = jax.nn.sigmoid(gi0[:, 0:H] + gh0[:, 0:H])
    z0 = jax.nn.sigmoid(gi0[:, H:2 * H] + gh0[:, H:2 * H])
    n0 = jnp.tanh(gi0[:, 2 * H:3 * H] + r0 * gh0[:, 2 * H:3 * H])
    h0n = (1.0 - z0) * n0 + z0 * h0
    hout_ref[0] = h0n

    # ---- GRU layer 1 ---------------------------------------------------------
    gi1 = jnp.dot(h0n.astype(jnp.bfloat16), wbig_ref[H:2 * H, :],
                  preferred_element_type=jnp.float32) \
        + small_ref[ROW_BIH1:ROW_BIH1 + 1, :]
    gh1 = jnp.dot(h1.astype(jnp.bfloat16), wbig_ref[2 * H:3 * H, :],
                  preferred_element_type=jnp.float32) \
        + small_ref[ROW_BHH1:ROW_BHH1 + 1, :]
    r1 = jax.nn.sigmoid(gi1[:, 0:H] + gh1[:, 0:H])
    z1 = jax.nn.sigmoid(gi1[:, H:2 * H] + gh1[:, H:2 * H])
    n1 = jnp.tanh(gi1[:, 2 * H:3 * H] + r1 * gh1[:, 2 * H:3 * H])
    h1n = (1.0 - z1) * n1 + z1 * h1
    hout_ref[1] = h1n

    # critic_linear: VPU multiply + lane reduce (no 1-column MXU tail)
    wc_row = small_ref[ROW_WC:ROW_WC + 1, 0:H]              # (1, H)
    bc = small_ref[ROW_BC:ROW_BC + 1, 0:1]                  # (1, 1)
    value_ref[...] = jnp.sum(h1n * wc_row, axis=-1, keepdims=True) + bc


# ---- offline parameter folding + packing ------------------------------------
def prepare_params(p):
    """Fold tgt_embed / prev-action embedding into wih0 and pack all params
    into two lane-dense slabs (done ONCE, reused every policy step)."""
    wih0 = p["wih0"]                                  # (64, 3H) pre-transposed
    wg_f = p["wg"] @ wih0[:32]                        # (3, 3H)
    wemb_f = p["emb"] @ wih0[32:]                     # (5, 3H)
    b0_f = p["bg"] @ wih0[:32] + p["bih0"]            # (1, 3H)
    wbig = jnp.concatenate([p["whh0"], p["wih1"], p["whh1"]],
                           axis=0).astype(jnp.bfloat16)       # (384, 384) bf16
    wc_row = jnp.zeros((1, G3), jnp.float32).at[0, :HIDDEN].set(p["wc"][:, 0])
    bc_row = jnp.zeros((1, G3), jnp.float32).at[0, 0].set(p["bc"][0, 0])
    pad = jnp.zeros((SMALL_ROWS - (ROW_BC + 1), G3), jnp.float32)
    small = jnp.concatenate(
        [wg_f, wemb_f, b0_f, p["bhh0"], p["bih1"], p["bhh1"], wc_row, bc_row, pad],
        axis=0)                                               # (16, 384) f32
    return {"wbig": wbig, "small": small}


def _net_forward_impl(prepped, goal, prev_actions, masks, hidden_states):
    """Pallas-backed Net.forward (blind config).
    Returns (value, features, new_hidden_states, cnn_feats=None).
    NOTE: hidden_states is aliased to the h' output inside the pallas_call;
    callers must not rely on reading hidden_states after this call."""
    # pack goal | prev_action(float) | mask | zero-pad into one (N, 8) f32 tile
    packed = jnp.concatenate(
        [goal,
         prev_actions.astype(jnp.float32),
         masks,
         jnp.zeros((N, PACK - GOAL_DIM - 2), jnp.float32)],
        axis=1)                                                        # (N, 8)

    vmem = pl.BlockSpec(memory_space=pltpu.MemorySpace.VMEM)
    value, h_out = pl.pallas_call(
        net_kernel,
        out_shape=(
            jax.ShapeDtypeStruct((N, 1), jnp.float32),
            jax.ShapeDtypeStruct((NUM_LAYERS, N, HIDDEN), jnp.float32),
        ),
        in_specs=[vmem] * 4,
        out_specs=(vmem, vmem),
        # hidden-state input (arg 1) aliases the h' output (output 1)
        input_output_aliases={1: 1},
    )(packed, hidden_states, prepped["wbig"], prepped["small"])
    # features output == last layer of h' (review: drop the duplicate output)
    return value, h_out[NUM_LAYERS - 1], h_out, None


net_forward = jax.jit(_net_forward_impl)


# ---- pure-JAX reference (mirrors the PyTorch forward + kernel rounding) -----
def ref_forward(p, goal, prev_actions, masks, hidden_states):
    # The kernel stores recurrent weights in bf16 and feeds bf16 activations
    # to the MXU with f32 accumulation; mirror that rounding exactly here.
    bf = lambda a: a.astype(jnp.bfloat16)
    idx = ((prev_actions.astype(jnp.float32) + 1.0) * masks).astype(jnp.int32)[:, 0]
    pa_emb = p["emb"][idx]
    goal_emb = goal @ p["wg"] + p["bg"][0]
    x = jnp.concatenate([goal_emb, pa_emb], axis=1)
    h_out = []
    for l in range(NUM_LAYERS):
        hp = hidden_states[l] * masks
        if l == 0:
            gi = x @ p["wih0"] + p["bih0"][0]                        # f32 path
        else:
            gi = jnp.dot(bf(x), bf(p["wih1"]),
                         preferred_element_type=jnp.float32) + p["bih1"][0]
        gh = jnp.dot(bf(hp), bf(p[f"whh{l}"]),
                     preferred_element_type=jnp.float32) + p[f"bhh{l}"][0]
        r = jax.nn.sigmoid(gi[:, :HIDDEN] + gh[:, :HIDDEN])
        z = jax.nn.sigmoid(gi[:, HIDDEN:2 * HIDDEN] + gh[:, HIDDEN:2 * HIDDEN])
        n = jnp.tanh(gi[:, 2 * HIDDEN:] + r * gh[:, 2 * HIDDEN:])
        hn = (1.0 - z) * n + z * hp
        h_out.append(hn)
        x = hn
    value = x @ p["wc"] + p["bc"][0]
    return value, x, jnp.stack(h_out)


def init_params(key):
    ks = jax.random.split(key, 12)

    def lin(k, fan_in, fan_out):
        return (jax.random.normal(k, (fan_in, fan_out), jnp.float32)
                / np.sqrt(fan_in)).astype(jnp.float32)

    p = {
        "wg": lin(ks[0], GOAL_DIM, 32),
        "bg": jnp.zeros((1, 32), jnp.float32),
        "emb": jax.random.normal(ks[1], (EMB_ROWS, ACT_EMB), jnp.float32),
        "wc": lin(ks[2], HIDDEN, 1),
        "bc": jnp.zeros((1, 1), jnp.float32),
    }
    in_sizes = [RNN_IN, HIDDEN]
    for l in range(NUM_LAYERS):
        p[f"wih{l}"] = lin(ks[3 + 4 * l], in_sizes[l], G3)
        p[f"whh{l}"] = lin(ks[4 + 4 * l], HIDDEN, G3)
        p[f"bih{l}"] = (0.01 * jax.random.normal(ks[5 + 4 * l], (1, G3))
                        ).astype(jnp.float32)
        p[f"bhh{l}"] = (0.01 * jax.random.normal(ks[6 + 4 * l], (1, G3))
                        ).astype(jnp.float32)
    return p


if __name__ == "__main__":
    key = jax.random.PRNGKey(0)
    k_par, k_goal, k_act, k_h, k_m = jax.random.split(key, 5)

    params = init_params(k_par)
    prepped = prepare_params(params)            # done once, reused per step

    goal = jax.random.normal(k_goal, (N, GOAL_DIM), jnp.float32)
    prev_actions = jax.random.randint(k_act, (N, 1), 0, 4, jnp.int32)  # actions 0..3
    hidden_states = jax.random.normal(k_h, (NUM_LAYERS, N, HIDDEN), jnp.float32)
    masks = (jax.random.uniform(k_m, (N, 1)) > 0.3).astype(jnp.float32)

    # reference first (computed from the original inputs, before the aliased call)
    v_ref, x_ref, h_ref = ref_forward(params, goal, prev_actions, masks, hidden_states)

    value, feats, h_new, cnn_feats = jax.block_until_ready(
        net_forward(prepped, goal, prev_actions, masks, hidden_states))

    np.testing.assert_allclose(np.asarray(value), np.asarray(v_ref), rtol=1e-3, atol=1e-3)
    np.testing.assert_allclose(np.asarray(feats), np.asarray(x_ref), rtol=1e-3, atol=1e-3)
    np.testing.assert_allclose(np.asarray(h_new), np.asarray(h_ref), rtol=1e-3, atol=1e-3)

    assert value.shape == (N, 1) and feats.shape == (N, HIDDEN)
    assert h_new.shape == (NUM_LAYERS, N, HIDDEN) and cnn_feats is None
    print("KERNEL_OK")
</pallas_src>

<mosaic_0001>
module attributes {stable_mosaic.version = 11 : i64} {
  func.func @net_kernel(%arg0: memref<8x8xf32, #tpu.memory_space<vmem>>, %arg1: memref<2x8x128xf32, #tpu.memory_space<vmem>>, %arg2: memref<384x384xbf16, #tpu.memory_space<vmem>>, %arg3: memref<16x384xf32, #tpu.memory_space<vmem>>, %arg4: memref<8x1xf32, #tpu.memory_space<vmem>>, %arg5: memref<2x8x128xf32, #tpu.memory_space<vmem>>) attributes {dimension_semantics = [], scalar_prefetch = 0 : i64, scratch_operands = 0 : i64, tpu.core_type = #tpu.core_type<tc>} {
    %c0 = arith.constant 0 : index
    %c0_0 = arith.constant 0 : index
    %0 = vector.load %arg0[%c0, %c0_0] : memref<8x8xf32, #tpu.memory_space<vmem>>, vector<8x8xf32>
    %1 = vector.extract_strided_slice %0 {offsets = [0, 4], sizes = [8, 1], strides = [1, 1]} : vector<8x8xf32> to vector<8x1xf32>
    %2 = vector.shape_cast %1 : vector<8x1xf32> to vector<8x1xf32>
    %3 = vector.broadcast %2 : vector<8x1xf32> to vector<8x128xf32>
    %c0_1 = arith.constant 0 : index
    %c0_2 = arith.constant 0 : index
    %c0_3 = arith.constant 0 : index
    %4 = vector.load %arg1[%c0_1, %c0_2, %c0_3] : memref<2x8x128xf32, #tpu.memory_space<vmem>>, vector<1x8x128xf32>
    %5 = vector.shape_cast %4 : vector<1x8x128xf32> to vector<8x128xf32>
    %6 = arith.mulf %5, %3 : vector<8x128xf32>
    %c1 = arith.constant 1 : index
    %c0_4 = arith.constant 0 : index
    %c0_5 = arith.constant 0 : index
    %7 = vector.load %arg1[%c1, %c0_4, %c0_5] : memref<2x8x128xf32, #tpu.memory_space<vmem>>, vector<1x8x128xf32>
    %8 = vector.shape_cast %7 : vector<1x8x128xf32> to vector<8x128xf32>
    %9 = arith.mulf %8, %3 : vector<8x128xf32>
    %10 = vector.extract_strided_slice %0 {offsets = [0, 3], sizes = [8, 1], strides = [1, 1]} : vector<8x8xf32> to vector<8x1xf32>
    %cst = arith.constant 1.000000e+00 : f32
    %11 = vector.broadcast %cst : f32 to vector<8x1xf32>
    %12 = arith.addf %10, %11 : vector<8x1xf32>
    %13 = arith.mulf %12, %1 : vector<8x1xf32>
    %14 = arith.fptosi %13 : vector<8x1xf32> to vector<8x1xi32>
    %15 = tpu.iota {dimensions = array<i32: 1>} : vector<8x8xi32>
    %c3_i32 = arith.constant 3 : i32
    %16 = vector.broadcast %c3_i32 : i32 to vector<8x8xi32>
    %17 = arith.subi %15, %16 : vector<8x8xi32>
    %18 = vector.broadcast %14 : vector<8x1xi32> to vector<8x8xi32>
    %19 = arith.cmpi eq, %17, %18 : vector<8x8xi32>
    %20 = arith.extui %19 : vector<8x8xi1> to vector<8x8xi32>
    %21 = arith.sitofp %20 : vector<8x8xi32> to vector<8x8xf32>
    %c3_i32_6 = arith.constant 3 : i32
    %22 = vector.broadcast %c3_i32_6 : i32 to vector<8x8xi32>
    %23 = arith.cmpi slt, %15, %22 : vector<8x8xi32>
    %24 = arith.select %23, %0, %21 : vector<8x8xi1>, vector<8x8xf32>
    %c0_7 = arith.constant 0 : index
    %c0_8 = arith.constant 0 : index
    %25 = vector.load %arg3[%c0_7, %c0_8] : memref<16x384xf32, #tpu.memory_space<vmem>>, vector<8x384xf32>
    %cst_9 = arith.constant dense<0.000000e+00> : vector<8x384xf32>
    %26 = tpu.matmul %24, %25, %cst_9 {dimension_numbers = #tpu.dot_dimension_numbers<[1], [0], [0], [1], [0, 0, 1, 1], [], []>} : vector<8x8xf32>, vector<8x384xf32>, vector<8x384xf32> -> vector<8x384xf32>
    %c8 = arith.constant 8 : index
    %c0_10 = arith.constant 0 : index
    %27 = vector.load %arg3[%c8, %c0_10] : memref<16x384xf32, #tpu.memory_space<vmem>>, vector<1x384xf32>
    %28 = vector.broadcast %27 : vector<1x384xf32> to vector<8x384xf32>
    %29 = arith.addf %26, %28 : vector<8x384xf32>
    %30 = arith.truncf %6 : vector<8x128xf32> to vector<8x128xbf16>
    %c0_11 = arith.constant 0 : index
    %c0_12 = arith.constant 0 : index
    %31 = vector.load %arg2[%c0_11, %c0_12] : memref<384x384xbf16, #tpu.memory_space<vmem>>, vector<128x384xbf16>
    %cst_13 = arith.constant dense<0.000000e+00> : vector<8x384xf32>
    %32 = tpu.matmul %30, %31, %cst_13 {dimension_numbers = #tpu.dot_dimension_numbers<[1], [0], [0], [1], [0, 0, 1, 1], [], []>} : vector<8x128xbf16>, vector<128x384xbf16>, vector<8x384xf32> -> vector<8x384xf32>
    %c9 = arith.constant 9 : index
    %c0_14 = arith.constant 0 : index
    %33 = vector.load %arg3[%c9, %c0_14] : memref<16x384xf32, #tpu.memory_space<vmem>>, vector<1x384xf32>
    %34 = vector.broadcast %33 : vector<1x384xf32> to vector<8x384xf32>
    %35 = arith.addf %32, %34 : vector<8x384xf32>
    %36 = vector.extract_strided_slice %29 {offsets = [0, 0], sizes = [8, 128], strides = [1, 1]} : vector<8x384xf32> to vector<8x128xf32>
    %37 = vector.extract_strided_slice %35 {offsets = [0, 0], sizes = [8, 128], strides = [1, 1]} : vector<8x384xf32> to vector<8x128xf32>
    %38 = arith.addf %36, %37 : vector<8x128xf32>
    %39 = arith.negf %38 : vector<8x128xf32>
    %40 = math.exp %39 : vector<8x128xf32>
    %cst_15 = arith.constant 1.000000e+00 : f32
    %41 = vector.broadcast %cst_15 : f32 to vector<8x128xf32>
    %42 = arith.addf %41, %40 : vector<8x128xf32>
    %43 = arith.divf %41, %42 : vector<8x128xf32>
    %44 = vector.extract_strided_slice %29 {offsets = [0, 128], sizes = [8, 128], strides = [1, 1]} : vector<8x384xf32> to vector<8x128xf32>
    %45 = vector.extract_strided_slice %35 {offsets = [0, 128], sizes = [8, 128], strides = [1, 1]} : vector<8x384xf32> to vector<8x128xf32>
    %46 = arith.addf %44, %45 : vector<8x128xf32>
    %47 = arith.negf %46 : vector<8x128xf32>
    %48 = math.exp %47 : vector<8x128xf32>
    %cst_16 = arith.constant 1.000000e+00 : f32
    %49 = vector.broadcast %cst_16 : f32 to vector<8x128xf32>
    %50 = arith.addf %49, %48 : vector<8x128xf32>
    %51 = arith.divf %49, %50 : vector<8x128xf32>
    %52 = vector.extract_strided_slice %29 {offsets = [0, 256], sizes = [8, 128], strides = [1, 1]} : vector<8x384xf32> to vector<8x128xf32>
    %53 = vector.extract_strided_slice %35 {offsets = [0, 256], sizes = [8, 128], strides = [1, 1]} : vector<8x384xf32> to vector<8x128xf32>
    %54 = arith.mulf %43, %53 : vector<8x128xf32>
    %55 = arith.addf %52, %54 : vector<8x128xf32>
    %56 = math.tanh %55 : vector<8x128xf32>
    %cst_17 = arith.constant 1.000000e+00 : f32
    %57 = vector.broadcast %cst_17 : f32 to vector<8x128xf32>
    %58 = arith.subf %57, %51 : vector<8x128xf32>
    %59 = arith.mulf %58, %56 : vector<8x128xf32>
    %60 = arith.mulf %51, %6 : vector<8x128xf32>
    %61 = arith.addf %59, %60 : vector<8x128xf32>
    %c0_18 = arith.constant 0 : index
    %c0_19 = arith.constant 0 : index
    %c0_20 = arith.constant 0 : index
    %62 = vector.load %arg5[%c0_18, %c0_19, %c0_20] : memref<2x8x128xf32, #tpu.memory_space<vmem>>, vector<1x8x128xf32>
    %63 = vector.shape_cast %62 : vector<1x8x128xf32> to vector<8x128xf32>
    %64 = vector.shape_cast %61 : vector<8x128xf32> to vector<1x8x128xf32>
    tpu.vector_store %arg5[%c0_18, %c0_19, %c0_20], %64 {strides = array<i32>} : memref<2x8x128xf32, #tpu.memory_space<vmem>>, vector<1x8x128xf32>,
    %65 = arith.truncf %61 : vector<8x128xf32> to vector<8x128xbf16>
    %c128 = arith.constant 128 : index
    %c0_21 = arith.constant 0 : index
    %66 = vector.load %arg2[%c128, %c0_21] : memref<384x384xbf16, #tpu.memory_space<vmem>>, vector<128x384xbf16>
    %cst_22 = arith.constant dense<0.000000e+00> : vector<8x384xf32>
    %67 = tpu.matmul %65, %66, %cst_22 {dimension_numbers = #tpu.dot_dimension_numbers<[1], [0], [0], [1], [0, 0, 1, 1], [], []>} : vector<8x128xbf16>, vector<128x384xbf16>, vector<8x384xf32> -> vector<8x384xf32>
    %c10 = arith.constant 10 : index
    %c0_23 = arith.constant 0 : index
    %68 = vector.load %arg3[%c10, %c0_23] : memref<16x384xf32, #tpu.memory_space<vmem>>, vector<1x384xf32>
    %69 = vector.broadcast %68 : vector<1x384xf32> to vector<8x384xf32>
    %70 = arith.addf %67, %69 : vector<8x384xf32>
    %71 = arith.truncf %9 : vector<8x128xf32> to vector<8x128xbf16>
    %c256 = arith.constant 256 : index
    %c0_24 = arith.constant 0 : index
    %72 = vector.load %arg2[%c256, %c0_24] : memref<384x384xbf16, #tpu.memory_space<vmem>>, vector<128x384xbf16>
    %cst_25 = arith.constant dense<0.000000e+00> : vector<8x384xf32>
    %73 = tpu.matmul %71, %72, %cst_25 {dimension_numbers = #tpu.dot_dimension_numbers<[1], [0], [0], [1], [0, 0, 1, 1], [], []>} : vector<8x128xbf16>, vector<128x384xbf16>, vector<8x384xf32> -> vector<8x384xf32>
    %c11 = arith.constant 11 : index
    %c0_26 = arith.constant 0 : index
    %74 = vector.load %arg3[%c11, %c0_26] : memref<16x384xf32, #tpu.memory_space<vmem>>, vector<1x384xf32>
    %75 = vector.broadcast %74 : vector<1x384xf32> to vector<8x384xf32>
    %76 = arith.addf %73, %75 : vector<8x384xf32>
    %77 = vector.extract_strided_slice %70 {offsets = [0, 0], sizes = [8, 128], strides = [1, 1]} : vector<8x384xf32> to vector<8x128xf32>
    %78 = vector.extract_strided_slice %76 {offsets = [0, 0], sizes = [8, 128], strides = [1, 1]} : vector<8x384xf32> to vector<8x128xf32>
    %79 = arith.addf %77, %78 : vector<8x128xf32>
    %80 = arith.negf %79 : vector<8x128xf32>
    %81 = math.exp %80 : vector<8x128xf32>
    %cst_27 = arith.constant 1.000000e+00 : f32
    %82 = vector.broadcast %cst_27 : f32 to vector<8x128xf32>
    %83 = arith.addf %82, %81 : vector<8x128xf32>
    %84 = arith.divf %82, %83 : vector<8x128xf32>
    %85 = vector.extract_strided_slice %70 {offsets = [0, 128], sizes = [8, 128], strides = [1, 1]} : vector<8x384xf32> to vector<8x128xf32>
    %86 = vector.extract_strided_slice %76 {offsets = [0, 128], sizes = [8, 128], strides = [1, 1]} : vector<8x384xf32> to vector<8x128xf32>
    %87 = arith.addf %85, %86 : vector<8x128xf32>
    %88 = arith.negf %87 : vector<8x128xf32>
    %89 = math.exp %88 : vector<8x128xf32>
    %cst_28 = arith.constant 1.000000e+00 : f32
    %90 = vector.broadcast %cst_28 : f32 to vector<8x128xf32>
    %91 = arith.addf %90, %89 : vector<8x128xf32>
    %92 = arith.divf %90, %91 : vector<8x128xf32>
    %93 = vector.extract_strided_slice %70 {offsets = [0, 256], sizes = [8, 128], strides = [1, 1]} : vector<8x384xf32> to vector<8x128xf32>
    %94 = vector.extract_strided_slice %76 {offsets = [0, 256], sizes = [8, 128], strides = [1, 1]} : vector<8x384xf32> to vector<8x128xf32>
    %95 = arith.mulf %84, %94 : vector<8x128xf32>
    %96 = arith.addf %93, %95 : vector<8x128xf32>
    %97 = math.tanh %96 : vector<8x128xf32>
    %cst_29 = arith.constant 1.000000e+00 : f32
    %98 = vector.broadcast %cst_29 : f32 to vector<8x128xf32>
    %99 = arith.subf %98, %92 : vector<8x128xf32>
    %100 = arith.mulf %99, %97 : vector<8x128xf32>
    %101 = arith.mulf %92, %9 : vector<8x128xf32>
    %102 = arith.addf %100, %101 : vector<8x128xf32>
    %c1_30 = arith.constant 1 : index
    %c0_31 = arith.constant 0 : index
    %c0_32 = arith.constant 0 : index
    %103 = vector.load %arg5[%c1_30, %c0_31, %c0_32] : memref<2x8x128xf32, #tpu.memory_space<vmem>>, vector<1x8x128xf32>
    %104 = vector.shape_cast %103 : vector<1x8x128xf32> to vector<8x128xf32>
    %105 = vector.shape_cast %102 : vector<8x128xf32> to vector<1x8x128xf32>
    tpu.vector_store %arg5[%c1_30, %c0_31, %c0_32], %105 {strides = array<i32>} : memref<2x8x128xf32, #tpu.memory_space<vmem>>, vector<1x8x128xf32>,
    %c12 = arith.constant 12 : index
    %c0_33 = arith.constant 0 : index
    %106 = vector.load %arg3[%c12, %c0_33] : memref<16x384xf32, #tpu.memory_space<vmem>>, vector<1x128xf32>
    %c13 = arith.constant 13 : index
    %c0_34 = arith.constant 0 : index
    %107 = vector.load %arg3[%c13, %c0_34] : memref<16x384xf32, #tpu.memory_space<vmem>>, vector<1x1xf32>
    %108 = vector.broadcast %106 : vector<1x128xf32> to vector<8x128xf32>
    %109 = arith.mulf %102, %108 : vector<8x128xf32>
    %cst_35 = arith.constant dense<0.000000e+00> : vector<8xf32>
    %110 = vector.multi_reduction <add>, %109, %cst_35 [1] : vector<8x128xf32> to vector<8xf32>
    %111 = vector.shape_cast %110 : vector<8xf32> to vector<8x1xf32>
    %112 = vector.broadcast %107 : vector<1x1xf32> to vector<8x1xf32>
    %113 = arith.addf %111, %112 : vector<8x1xf32>
    %c0_36 = arith.constant 0 : index
    %c0_37 = arith.constant 0 : index
    %114 = vector.load %arg4[%c0_36, %c0_37] : memref<8x1xf32, #tpu.memory_space<vmem>>, vector<8x1xf32>
    tpu.vector_store %arg4[%c0_36, %c0_37], %113 {strides = array<i32>} : memref<8x1xf32, #tpu.memory_space<vmem>>, vector<8x1xf32>,
    return
  }
}

</mosaic_0001>

<bundles_post_ra>
// kernel: _net_forward_impl.1
= control target key start
LH: loop header
LB: loop body
LE: loop exit
PB: predicated region body
PF: predicated region fallthrough
CT: control target
= control target key end

     0   :  { %11 = vsyncpa [#allocation3], 0  ;;  %s1463_s0 = inlined_call_operand.vmem [shape: f32[8,8], index: 0, kind: input, shape index: {}]   ;;  %s1464_s1 = inlined_call_operand.vmem [shape: f32[2,8,128], index: 1, kind: input, shape index: {}, may-alias: {1,5}]   ;;  %s1465_s2 = inlined_call_operand.hbm [shape: bf16[384,384], index: 2, kind: input, shape index: {}]   ;;  %s1466_s3 = inlined_call_operand.hbm [shape: f32[16,384], index: 3, kind: input, shape index: {}]   ;;  %s1467_s4 = inlined_call_operand.vmem [shape: f32[8,1], index: 4, kind: output, shape index: {0}]   ;;  %s1468_s5 = inlined_call_operand.vmem [shape: f32[2,8,128], index: 5, kind: output, shape index: {1}, may-alias: {1,5}]  }
   0x1   :  { %s21_s20 = sshll.u32 %s1465_s2, 4  ;;  %s22_s20 = int_to_ptr.hbm [resolvable:$true] %s21_s20 }
   0x2   :  { %12 = vsyncpa [#allocation5], 0  ;;  %s1358_s21 = smov [#allocation2]   ;;  %s34_s25 = sshll.u32 %s1466_s3, 4  ;;  %s35_s25 = int_to_ptr.hbm [resolvable:$true] %s34_s25 }
   0x3   :  { %s23_s22 = sshll.u32 %s1358_s21, 4  ;;  %s1359_s26 = smov 192   ;;  %s24_s22 = int_to_ptr.vmem [resolvable:$true] %s23_s22 }
   0x4   :  { %s1360_s27 = smov 12   ;;  %s1361_s28 = smov [#allocation4]  }
   0x5   :  { %29 = dma.hbm_to_vmem [thread:$0]  %s22_s20, 9216, %s24_s22, [#allocation3], %s1359_s26, %s1359_s26, %s1360_s27  }
   0x6   :  { %s36_s29 = sshll.u32 %s1361_s28, 4  ;;  %s1362_s30 = smov 384   ;;  %s37_s29 = int_to_ptr.vmem [resolvable:$true] %s36_s29 }
   0x7   :  { %s1363_s6 = smov 24  }
   0x8   :  { %42 = dma.hbm_to_vmem [thread:$0]  %s35_s25, 768, %s37_s29, [#allocation5], %s1362_s30, %s1362_s30, %s1363_s6  }
   0x9   :  { %1354 = dma.done.wait [#allocation3], 9216  }
   0xa   :  { %1355 = vsyncadd [#allocation3], 4294958080 }
   0xb   :  { %1356 = dma.done.wait [#allocation5], 768  }
   0xc   :  { %1357 = vsyncadd [#allocation5], 4294966528  ;;  %v1364_v0 = vmov 4   ;;  %v1407_v1 = vld [vmem:[%s1463_s0] sm:$0xff]  ;;  %s1365_s3 = smov 127   ;;  %v1366_v2 = vmov 3  }
   0xd   :  { %1283 = vset.pattern.permute.xlu0 %v1364_v0  ;;  %1284 = vset.pattern.permute.xlu1 %v1366_v2  ;;  %v989_v3 = vld [vmem:[#allocation2 + $0xa8] sm:$0xf]  ;;  %v1218_v4 = vld [vmem:[#allocation2 + $0xb0] sm:$0xf0]  ;;  %v977_v5 = vld [vmem:[#allocation2 + $0x90] sm:$0xf] }
   0xe   :  { %63 = vrot.lane.b32.xlu0 %v1407_v1, %s1365_s3  ;;  %v990_v6 = vor.u32 %v1218_v4, %v989_v3  ;;  %v1215_v7 = vld [vmem:[#allocation2 + $0x98] sm:$0xf0]  ;;  %v80_v8 = vld [vmem:[#allocation4 + $0x8] sm:$0xff]  ;;  %v997_v10 = vld [vmem:[#allocation2 + $0xb0] sm:$0xf]  ;;  %v62_v56 = vadd.f32 1.0, %v1407_v1 }
   0xf   :  { %v978_v9 = vor.u32 %v1215_v7, %v977_v5  ;;  %130 = vmatpush.msra.mxu1 %v80_v8  ;;  %v965_v11 = vld [vmem:[#allocation2 + $0x78] sm:$0xf]  ;;  %v1212_v12 = vld [vmem:[#allocation2 + $0x80] sm:$0xf0]  ;;  %v1219_v13 = vld [vmem:[#allocation2 + $0xb8] sm:$0xf0] }
  0x10   :  { %325 = vmatpush.bf16.msra.mxu3 %v990_v6  ;;  %v998_v14 = vor.u32 %v1219_v13, %v997_v10  ;;  %v985_v15 = vld [vmem:[#allocation2 + $0x98] sm:$0xf]  ;;  %v1216_v16 = vld [vmem:[#allocation2 + $0xa0] sm:$0xf0]  ;;  %v1217_v18 = vld [vmem:[#allocation2 + $0xac] sm:$0xf]  ;;  %v966_v20 = vor.u32 %v1212_v12, %v965_v11 }
  0x11   :  { %v79_v17 = vld [vmem:[#allocation4] sm:$0xff]  ;;  %v991_v19 = vld [vmem:[#allocation2 + $0xb4] sm:$0xf0]  ;;  %v1209_v22 = vld [vmem:[#allocation2 + $0x68] sm:$0xf0]  ;;  %v986_v23 = vor.u32 %v1216_v16, %v985_v15  ;;  %vm91_vm3 = vcmask 64512  }
  0x12   :  { %110 = vmatpush.msra.mxu0 %v79_v17  ;;  %v953_v21 = vld [vmem:[#allocation2 + $0x60] sm:$0xf]  ;;  %351 = vmatpush.bf16.msrb.mxu1 %v998_v14  ;;  %v994_v24 = vor.u32 %v1217_v18, %v991_v19  ;;  %v1213_v26 = vld [vmem:[#allocation2 + $0x88] sm:$0xf0]  ;;  %v1214_v27 = vld [vmem:[#allocation2 + $0x94] sm:$0xf] }
  0x13   :  { %v973_v25 = vld [vmem:[#allocation2 + $0x80] sm:$0xf]  ;;  %v1211_v30 = vld [vmem:[#allocation2 + $0x7c] sm:$0xf]  ;;  %v954_v31 = vor.u32 %v1209_v22, %v953_v21  ;;  %v941_v32 = vld [vmem:[#allocation2 + $0x48] sm:$0xf] }
  0x14   :  { %326 = vmatpush.bf16.msra.mxu3 %v978_v9  ;;  %v979_v28 = vld [vmem:[#allocation2 + $0x9c] sm:$0xf0]  ;;  %338 = vmatpush.bf16.msrb.mxu0 %v994_v24  ;;  %v974_v33 = vor.u32 %v1213_v26, %v973_v25  ;;  %v967_v34 = vld [vmem:[#allocation2 + $0x84] sm:$0xf0]  ;;  %v1206_v35 = vld [vmem:[#allocation2 + $0x50] sm:$0xf0]  ;;  %v68_v26 = vlaneseq }
  0x15   :  { %v982_v29 = vor.u32 %v1214_v27, %v979_v28  ;;  %v961_v36 = vld [vmem:[#allocation2 + $0x68] sm:$0xf]  ;;  %v1210_v37 = vld [vmem:[#allocation2 + $0x70] sm:$0xf0]  ;;  %v970_v38 = vor.u32 %v1211_v30, %v967_v34  ;;  %v1208_v39 = vld [vmem:[#allocation2 + $0x64] sm:$0xf]  ;;  %v942_v41 = vor.u32 %v1206_v35, %v941_v32 }
  0x16   :  { %54 = vperm.xlu0 %1283, %v1407_v1   ;;  %352 = vmatpush.bf16.msrb.mxu1 %v986_v23  ;;  %v955_v40 = vld [vmem:[#allocation2 + $0x6c] sm:$0xf0]  ;;  %v962_v43 = vor.u32 %v1210_v37, %v961_v36  ;;  %v1203_v44 = vld [vmem:[#allocation2 + $0x38] sm:$0xf0]  ;;  %v1205_v48 = vld [vmem:[#allocation2 + $0x4c] sm:$0xf] }
  0x17   :  { %v929_v42 = vld [vmem:[#allocation2 + $0x30] sm:$0xf]  ;;  %v1207_v46 = vld [vmem:[#allocation2 + $0x58] sm:$0xf0]  ;;  %v958_v47 = vor.u32 %v1208_v39, %v955_v40  ;;  %v943_v49 = vld [vmem:[#allocation2 + $0x54] sm:$0xf0] }
  0x18   :  { %327 = vmatpush.bf16.msra.mxu3 %v966_v20  ;;  %339 = vmatpush.bf16.msrb.mxu0 %v982_v29  ;;  %v949_v45 = vld [vmem:[#allocation2 + $0x50] sm:$0xf]  ;;  %v930_v50 = vor.u32 %v1203_v44, %v929_v42  ;;  %v917_v51 = vld [vmem:[#allocation2 + $0x18] sm:$0xf]  ;;  %v1200_v53 = vld [vmem:[#allocation2 + $0x20] sm:$0xf0]  ;;  %v946_v57 = vor.u32 %v1205_v48, %v943_v49 }
  0x19   :  { %v950_v52 = vor.u32 %v1207_v46, %v949_v45  ;;  %v937_v54 = vld [vmem:[#allocation2 + $0x38] sm:$0xf]  ;;  %v1204_v55 = vld [vmem:[#allocation2 + $0x40] sm:$0xf0]  ;;  %v918_v58 = vor.u32 %v1200_v53, %v917_v51  ;;  %v905_v59 = vld [vmem:[#allocation2] sm:$0xf] }
  0x1a   :  { %353 = vmatpush.bf16.msrb.mxu1 %v974_v33  ;;  %v1197_v60 = vld [vmem:[#allocation2 + $0x8] sm:$0xf0]  ;;  %v938_v61 = vor.u32 %v1204_v55, %v937_v54  ;;  %v925_v63 = vld [vmem:[#allocation2 + $0x20] sm:$0xf]  ;;  %v1202_v13 = vld [vmem:[#allocation2 + $0x34] sm:$0xf] }
  0x1b   :  { %v1201_v0 = vld [vmem:[#allocation2 + $0x28] sm:$0xf0]  ;;  %v906_v3 = vor.u32 %v1197_v60, %v905_v59  ;;  %v57_v9 = vld [vmem:[%s1464_s1] sm:$0xff]  ;;  %v913_v16 = vld [vmem:[#allocation2 + $0x8] sm:$0xf]  ;;  %v69_v27 = vand.u32 127, %v68_v26 }
  0x1c   :  { %328 = vmatpush.bf16.msra.mxu3 %v954_v31  ;;  %340 = vmatpush.bf16.msrb.mxu0 %v970_v38  ;;  %v926_v6 = vor.u32 %v1201_v0, %v925_v63  ;;  %v931_v14 = vld [vmem:[#allocation2 + $0x3c] sm:$0xf0]  ;;  %v1198_v17 = vld [vmem:[#allocation2 + $0x10] sm:$0xf0]  ;;  %v1199_v20 = vld [vmem:[#allocation2 + $0x1c] sm:$0xf] }
  0x1d   :  { %v934_v15 = vor.u32 %v1202_v13, %v931_v14  ;;  %v914_v18 = vor.u32 %v1198_v17, %v913_v16  ;;  %v81_v19 = vld [vmem:[#allocation4 + $0x10] sm:$0xff]  ;;  %v919_v21 = vld [vmem:[#allocation2 + $0x24] sm:$0xf0]  ;;  %v1196_v23 = vld [vmem:[#allocation2 + $0x4] sm:$0xf]  ;;  %v898_v28 = vadd.s32 4294967293, %v69_v27 }
  0x1e   :  { %1285 = vset.pattern.permute.xlu0 %v1366_v2  ;;  %354 = vmatpush.bf16.msrb.mxu1 %v962_v43  ;;  %v922_v22 = vor.u32 %v1199_v20, %v919_v21  ;;  %v907_v24 = vld [vmem:[#allocation2 + $0xc] sm:$0xf0]  ;;  %v1183_v29 = vld [vmem:[#allocation2 + $0x228] sm:$0xf]  ;;  %v1266_v30 = vld [vmem:[#allocation2 + $0x230] sm:$0xf0] }
  0x1f   :  { %150 = vmatpush.msra.mxu2 %v81_v19  ;;  %v910_v25 = vor.u32 %v1196_v23, %v907_v24  ;;  %vm77_vm1 = vcmp.lt.s32.totalorder %v69_v27, 3  ;;  %v1184_v32 = vor.u32 %v1266_v30, %v1183_v29  ;;  %v1367_v33 = vmov 0.0   ;;  %v1171_v35 = vld [vmem:[#allocation2 + $0x210] sm:$0xf]  ;;  %v1263_v36 = vld [vmem:[#allocation2 + $0x218] sm:$0xf0] }
  0x20   :  { %329 = vmatpush.bf16.msra.mxu3 %v942_v41  ;;  %341 = vmatpush.bf16.msrb.mxu0 %v958_v47  ;;  %v1172_v38 = vor.u32 %v1263_v36, %v1171_v35  ;;  %v1159_v39 = vld [vmem:[#allocation2 + $0x1f8] sm:$0xf]  ;;  %v1260_v40 = vld [vmem:[#allocation2 + $0x200] sm:$0xf0]  ;;  %v1147_v42 = vld [vmem:[#allocation2 + $0x1e0] sm:$0xf] }
  0x21   :  { %v1160_v41 = vor.u32 %v1260_v40, %v1159_v39  ;;  %v1257_v43 = vld [vmem:[#allocation2 + $0x1e8] sm:$0xf0]  ;;  %v1135_v45 = vld [vmem:[#allocation2 + $0x1c8] sm:$0xf]  ;;  %v1254_v46 = vld [vmem:[#allocation2 + $0x1d0] sm:$0xf0] }
  0x22   :  { %355 = vmatpush.bf16.msrb.mxu1 %v950_v52  ;;  %v1148_v44 = vor.u32 %v1257_v43, %v1147_v42  ;;  %v1136_v47 = vor.u32 %v1254_v46, %v1135_v45  ;;  %v1251_v48 = vld [vmem:[#allocation2 + $0x1b8] sm:$0xf0]  ;;  %v1248_v51 = vld [vmem:[#allocation2 + $0x1a0] sm:$0xf0]  ;;  %v1099_v54 = vld [vmem:[#allocation2 + $0x180] sm:$0xf] }
  0x23   :  { %v1245_v55 = vld [vmem:[#allocation2 + $0x188] sm:$0xf0]  ;;  %v1235_v13 = vld [vmem:[#allocation2 + $0x13c] sm:$0xf]  ;;  %v1051_v17 = vld [vmem:[#allocation2 + $0x120] sm:$0xf] }
  0x24   :  { %330 = vmatpush.bf16.msra.mxu3 %v930_v50  ;;  %342 = vmatpush.bf16.msrb.mxu0 %v946_v57  ;;  %v1111_v50 = vld [vmem:[#allocation2 + $0x198] sm:$0xf]  ;;  %v1100_v57 = vor.u32 %v1245_v55, %v1099_v54  ;;  %v1241_v63 = vld [vmem:[#allocation2 + $0x16c] sm:$0xf]  ;;  %v1232_v19 = vld [vmem:[#allocation2 + $0x124] sm:$0xf] }
  0x25   :  { %v1112_v53 = vor.u32 %v1248_v51, %v1111_v50  ;;  %v1053_v21 = vld [vmem:[#allocation2 + $0x12c] sm:$0xf0]  ;;  %v1243_v23 = vld [vmem:[#allocation2 + $0x178] sm:$0xf0]  ;;  %v1039_v26 = vld [vmem:[#allocation2 + $0x108] sm:$0xf] }
  0x26   :  { %356 = vmatpush.bf16.msrb.mxu1 %v938_v61  ;;  %v1087_v61 = vld [vmem:[#allocation2 + $0x168] sm:$0xf]  ;;  %v1056_v24 = vor.u32 %v1232_v19, %v1053_v21  ;;  %v1230_v27 = vld [vmem:[#allocation2 + $0x110] sm:$0xf0]  ;;  %v1041_v30 = vld [vmem:[#allocation2 + $0x114] sm:$0xf0] }
  0x27   :  { %v1040_v29 = vor.u32 %v1230_v27, %v1039_v26  ;;  %v1436_v35 = vld [vmem:[#allocation4 + $0x19] ss:$8 sm:$0x7]  ;;  %v1438_v36 = vld [vmem:[#allocation4 + $0x18] ss:$8 sm:$0x7] }
  0x28   :  { %331 = vmatpush.bf16.msra.mxu3 %v918_v58  ;;  %343 = vmatpush.bf16.msrb.mxu0 %v934_v15  ;;  %v1065_v15 = vld [vmem:[#allocation2 + $0x144] sm:$0xf0]  ;;  %v1226_v39 = vld [vmem:[#allocation2 + $0xf4] sm:$0xf]  ;;  %v1071_v42 = vld [vmem:[#allocation2 + $0x140] sm:$0xf] }
  0x29   :  { %v1068_v16 = vor.u32 %v1235_v13, %v1065_v15  ;;  %v1237_v43 = vld [vmem:[#allocation2 + $0x148] sm:$0xf0]  ;;  %v191_v46 = vperm.slane %v1436_v35, 0  ;;  %v1017_v51 = vld [vmem:[#allocation2 + $0xe4] sm:$0xf0]  ;;  %v86_v15 = vperm.slane %v1438_v36, 1 }
  0x2a   :  { %357 = vmatpush.bf16.msrb.mxu1 %v926_v6  ;;  %v1072_v45 = vor.u32 %v1237_v43, %v1071_v42  ;;  %v1234_v54 = vld [vmem:[#allocation2 + $0x130] sm:$0xf0]  ;;  %v1035_v19 = vld [vmem:[#allocation2 + $0xf8] sm:$0xf]  ;;  %v1264_v26 = vld [vmem:[#allocation2 + $0x220] sm:$0xf0] }
  0x2b   :  { %v1011_v43 = vld [vmem:[#allocation2 + $0xc8] sm:$0xf] }
  0x2c   :  { %332 = vmatpush.bf16.msra.mxu3 %v906_v3  ;;  %344 = vmatpush.bf16.msrb.mxu0 %v922_v22  ;;  %v1095_v22 = vld [vmem:[#allocation2 + $0x170] sm:$0xf] }
  0x2e   :  { %358 = vmatpush.bf16.msrb.mxu1 %v914_v18  ;;  %v1233_v18 = vld [vmem:[#allocation2 + $0x128] sm:$0xf0] }
  0x2f   :  { %v1052_v20 = vor.u32 %v1233_v18, %v1051_v17 }
  0x30   :  { %345 = vmatpush.bf16.msrb.mxu0 %v910_v25  ;;  %v1096_v25 = vor.u32 %v1243_v23, %v1095_v22  ;;  %v1262_v22 = vld [vmem:[#allocation2 + $0x214] sm:$0xf]  ;;  %v1173_v23 = vld [vmem:[#allocation2 + $0x21c] sm:$0xf0] }
  0x80   :  { %v64_v62 = vpop.permute.xlu0 %63 }
  0x81   :  { %v66_v2 = vmul.f32 %v64_v62, %v62_v56  ;;  %v897_v56 = vld [vmem:[%s1464_s1 + $0x8] sm:$0xff]  ;;  %v1242_v62 = vld [vmem:[#allocation2 + $0x170] sm:$0xf0] }
  0x82   :  { %v1088_v0 = vor.u32 %v1242_v62, %v1087_v61  ;;  %v1003_v62 = vld [vmem:[#allocation2 + $0xc0] sm:$0xf] }
  0x83   :  { %v1269_v4 = vceil.f32 %v66_v2  ;;  %v1270_v5 = vfloor.f32 %v66_v2  ;;  %vm1268_vm0 = vcmp.lt.s32.totalorder %v66_v2, 0  ;;  %v1089_v2 = vld [vmem:[#allocation2 + $0x174] sm:$0xf0] }
  0x84   :  { %v1092_v3 = vor.u32 %v1241_v63, %v1089_v2  ;;  %582 = vmatpush.bf16.msrb.mxu2 %v1088_v0  ;;  %v1221_v63 = vld [vmem:[#allocation2 + $0xc8] sm:$0xf0]  ;;  %v1220_v0 = vld [vmem:[#allocation2 + $0xc4] sm:$0xf] }
  0x85   :  { %v1271_v7 = vsel %vm1268_vm0, %v1269_v4, %v1270_v5  ;;  %v1075_v4 = vld [vmem:[#allocation2 + $0x150] sm:$0xf]  ;;  %v1239_v5 = vld [vmem:[#allocation2 + $0x158] sm:$0xf0] }
  0x86   :  { %v1272_v8 = vcvt.f32.s32 %v1271_v7  ;;  %595 = vmatpush.bf16.msrb.mxu3 %v1092_v3  ;;  %v1076_v6 = vor.u32 %v1239_v5, %v1075_v4  ;;  %v1238_v7 = vld [vmem:[#allocation2 + $0x154] sm:$0xf]  ;;  %v1004_v3 = vor.u32 %v1221_v63, %v1003_v62  ;;  %v1005_v4 = vld [vmem:[#allocation2 + $0xcc] sm:$0xf0] }
  0x87   :  { %v1047_v5 = vld [vmem:[#allocation2 + $0x110] sm:$0xf] }
  0x88   :  { %72 = vperm.xlu1 %1284, %v1272_v8   ;;  %v1415_v10 = vpop.permute.xlu0 %54  ;;  %v1077_v8 = vld [vmem:[#allocation2 + $0x15c] sm:$0xf0]  ;;  %583 = vmatpush.bf16.msrb.mxu2 %v1076_v6  ;;  %v1231_v6 = vld [vmem:[#allocation2 + $0x118] sm:$0xf0]  ;;  %v1143_v62 = vld [vmem:[#allocation2 + $0x1d0] sm:$0xf] }
  0x89   :  { %v1418_v11 = vmul.f32 %v57_v9, %v1415_v10  ;;  %v1429_v58 = vmul.f32 %v897_v56, %v1415_v10  ;;  %v1080_v9 = vor.u32 %v1238_v7, %v1077_v8  ;;  %v1063_v10 = vld [vmem:[#allocation2 + $0x138] sm:$0xf]  ;;  %v1008_v7 = vor.u32 %v1220_v0, %v1005_v4  ;;  %v1255_v0 = vld [vmem:[#allocation2 + $0x1d8] sm:$0xf0]  ;;  %v1125_v4 = vld [vmem:[#allocation2 + $0x1bc] sm:$0xf0] }
  0x8a   :  { %v1048_v8 = vor.u32 %v1231_v6, %v1047_v5  ;;  %v1131_v5 = vld [vmem:[#allocation2 + $0x1b8] sm:$0xf]  ;;  %v1252_v6 = vld [vmem:[#allocation2 + $0x1c0] sm:$0xf0] }
  0x8b   :  { %v155_v12 = vpack.c.bf16 %v1418_v11, %v1418_v11  ;;  %v1433_v60 = vpack.c.bf16 %v1429_v58, %v1429_v58  ;;  %596 = vmatpush.bf16.msrb.mxu3 %v1080_v9  ;;  %v1265_v9 = vld [vmem:[#allocation2 + $0x22c] sm:$0xf] }
  0x8d   :  { %333 = vmatmul.bf16.vlgmr.msra.gmra.mxu3 %v155_v12 }
  0x8f   :  { %597 = vmatpush.bf16.msrb.mxu3 %v1068_v16  ;;  %v192_v16 = vperm.slane %v1436_v35, 1 }
  0x93   :  { %598 = vmatpush.bf16.msrb.mxu3 %v1056_v24  ;;  %v1179_v24 = vld [vmem:[#allocation2 + $0x218] sm:$0xf] }
  0xfa   :  { %v73_v31 = vpop.permute.xlu1 %72 }
  0xfb   :  { %vm74_vm2 = vcmp.eq.s32.totalorder %v898_v28, %v73_v31  ;;  %v1229_v28 = vld [vmem:[#allocation2 + $0x10c] sm:$0xf]  ;;  %v1083_v31 = vld [vmem:[#allocation2 + $0x158] sm:$0xf] }
  0xfc   :  { %v899_v34 = vsel %vm74_vm2, 1.0, %v1367_v33  ;;  %v1044_v33 = vor.u32 %v1229_v28, %v1041_v30  ;;  %v1023_v30 = vld [vmem:[#allocation2 + $0xe0] sm:$0xf] }
  0xfd   :  { %v78_v37 = vsel %vm77_vm1, %v1407_v1, %v899_v34  ;;  %v1123_v1 = vld [vmem:[#allocation2 + $0x1b0] sm:$0xf] }
  0xfe   :  { %900 = vmatmul.msk.f32.vlgmr.msra.gmra.mxu0 %vm91_vm3, %v78_v37  ;;  %901 = vmatmul.msk.f32.vlgmr.msra.gmra.mxu1 %vm91_vm3, %v78_v37  ;;  %v1124_v49 = vor.u32 %v1251_v48, %v1123_v1  ;;  %v1015_v1 = vld [vmem:[#allocation2 + $0xd8] sm:$0xf]  ;;  %v1224_v48 = vld [vmem:[#allocation2 + $0xe0] sm:$0xf0] }
  0xff   :  { %902 = vmatmul.msk.f32.vlgmr.msra.gmra.mxu2 %vm91_vm3, %v78_v37  ;;  %791 = vmatpush.bf16.msra.mxu1 %v1184_v32  ;;  %v1240_v32 = vld [vmem:[#allocation2 + $0x160] sm:$0xf0]  ;;  %v1027_v37 = vld [vmem:[#allocation2 + $0xf0] sm:$0xf]  ;;  %v1016_v50 = vor.u32 %v1224_v48, %v1015_v1  ;;  %v1155_v1 = vld [vmem:[#allocation2 + $0x1e8] sm:$0xf] }
 0x100   :  { %608 = vmatpush.bf16.msra.mxu0 %v1096_v25  ;;  %v1084_v34 = vor.u32 %v1240_v32, %v1083_v31  ;;  %599 = vmatpush.bf16.msrb.mxu3 %v1044_v33  ;;  %v1176_v25 = vor.u32 %v1262_v22, %v1173_v23  ;;  %v1225_v31 = vld [vmem:[#allocation2 + $0xe8] sm:$0xf0]  ;;  %v1259_v32 = vld [vmem:[#allocation2 + $0x1fc] sm:$0xf]  ;;  %v1258_v48 = vld [vmem:[#allocation2 + $0x1f0] sm:$0xf0] }
 0x101   :  { %v1244_v22 = vld [vmem:[#allocation2 + $0x184] sm:$0xf]  ;;  %v1101_v23 = vld [vmem:[#allocation2 + $0x18c] sm:$0xf0] }
 0x103   :  { %792 = vmatpush.bf16.msra.mxu1 %v1172_v38  ;;  %v1227_v38 = vld [vmem:[#allocation2 + $0xf8] sm:$0xf0] }
 0x104   :  { %609 = vmatpush.bf16.msra.mxu0 %v1084_v34  ;;  %v1028_v40 = vor.u32 %v1227_v38, %v1027_v37  ;;  %v1024_v37 = vor.u32 %v1225_v31, %v1023_v30  ;;  %v1161_v38 = vld [vmem:[#allocation2 + $0x204] sm:$0xf0]  ;;  %v1104_v31 = vor.u32 %v1244_v22, %v1101_v23 }
 0x106   :  { %346 = vmatmul.bf16.vlgmr.msrb.gmra.mxu0 %v155_v12  ;;  %359 = vmatmul.bf16.vlgmr.msrb.gmra.mxu1 %v155_v12  ;;  %v1236_v12 = vld [vmem:[#allocation2 + $0x140] sm:$0xf0] }
 0x107   :  { %793 = vmatpush.bf16.msra.mxu1 %v1160_v41  ;;  %v1064_v14 = vor.u32 %v1236_v12, %v1063_v10  ;;  %v1029_v41 = vld [vmem:[#allocation2 + $0xfc] sm:$0xf0]  ;;  %v1185_v10 = vld [vmem:[#allocation2 + $0x234] sm:$0xf0]  ;;  %v1191_v12 = vld [vmem:[#allocation2 + $0x230] sm:$0xf] }
 0x108   :  { %610 = vmatpush.bf16.msra.mxu0 %v1072_v45  ;;  %v1256_v45 = vld [vmem:[#allocation2 + $0x1e4] sm:$0xf] }
 0x109   :  { %584 = vmatpush.bf16.msrb.mxu2 %v1064_v14  ;;  %v1267_v14 = vld [vmem:[#allocation2 + $0x238] sm:$0xf0] }
 0x10a   :  { %v1192_v17 = vor.u32 %v1267_v14, %v1191_v12  ;;  %v1132_v12 = vor.u32 %v1252_v6, %v1131_v5 }
 0x10b   :  { %794 = vmatpush.bf16.msra.mxu1 %v1148_v44  ;;  %v1032_v44 = vor.u32 %v1226_v39, %v1029_v41  ;;  %v1167_v39 = vld [vmem:[#allocation2 + $0x200] sm:$0xf]  ;;  %v1164_v41 = vor.u32 %v1259_v32, %v1161_v38 }
 0x10d   :  { %585 = vmatpush.bf16.msrb.mxu2 %v1052_v20  ;;  %600 = vmatpush.bf16.msrb.mxu3 %v1032_v44  ;;  %v1228_v20 = vld [vmem:[#allocation2 + $0x100] sm:$0xf0]  ;;  %v1222_v44 = vld [vmem:[#allocation2 + $0xd0] sm:$0xf0] }
 0x10e   :  { %v1036_v21 = vor.u32 %v1228_v20, %v1035_v19  ;;  %v193_v19 = vperm.slane %v1436_v35, 2 }
 0x10f   :  { %795 = vmatpush.bf16.msra.mxu1 %v1136_v47  ;;  %v85_v47 = vperm.slane %v1438_v36, 0 }
 0x110   :  { %v1423_v52 = vpop.f32.mrf.mxu3 }
 0x111   :  { %586 = vmatpush.bf16.msrb.mxu2 %v1040_v29  ;;  %v1180_v29 = vor.u32 %v1264_v26, %v1179_v24  ;;  %v1107_v26 = vld [vmem:[#allocation2 + $0x188] sm:$0xf] }
 0x113   :  { %796 = vmatpush.bf16.msra.mxu1 %v1124_v49  ;;  %v1223_v49 = vld [vmem:[#allocation2 + $0xdc] sm:$0xf] }
 0x114   :  { %v1020_v55 = vor.u32 %v1223_v49, %v1017_v51  ;;  %v1012_v49 = vor.u32 %v1222_v44, %v1011_v43 }
 0x115   :  { %587 = vmatpush.bf16.msrb.mxu2 %v1028_v40  ;;  %v1261_v40 = vld [vmem:[#allocation2 + $0x208] sm:$0xf0] }
 0x116   :  { %601 = vmatpush.bf16.msrb.mxu3 %v1020_v55  ;;  %v1168_v42 = vor.u32 %v1261_v40, %v1167_v39  ;;  %v1156_v55 = vor.u32 %v1258_v48, %v1155_v1 }
 0x117   :  { %797 = vmatpush.bf16.msra.mxu1 %v1112_v53  ;;  %v1059_v53 = vld [vmem:[#allocation2 + $0x128] sm:$0xf] }
 0x118   :  { %v336_v59 = vpop.f32.mrf.mxu3  ;;  %v1060_v56 = vor.u32 %v1234_v54, %v1059_v53 }
 0x119   :  { %588 = vmatpush.bf16.msrb.mxu2 %v1016_v50 }
 0x11a   :  { %611 = vmatpush.bf16.msra.mxu0 %v1060_v56  ;;  %602 = vmatpush.bf16.msrb.mxu3 %v1008_v7 }
 0x11b   :  { %798 = vmatpush.bf16.msra.mxu1 %v1100_v57  ;;  %v335_v57 = vadd.f32 %v1423_v52, %v191_v46  ;;  %v1188_v52 = vor.u32 %v1265_v9, %v1185_v10 }
 0x11d   :  { %589 = vmatpush.bf16.msrb.mxu2 %v1004_v3  ;;  %v1250_v3 = vld [vmem:[#allocation2 + $0x1b4] sm:$0xf] }
 0x11e   :  { %799 = vmatmul.bf16.vlgmr.msra.gmra.mxu1 %v1433_v60  ;;  %612 = vmatpush.bf16.msra.mxu0 %v1048_v8  ;;  %v1128_v8 = vor.u32 %v1250_v3, %v1125_v4 }
 0x11f   :  { %817 = vmatpush.bf16.msra.mxu3 %v1192_v17 }
 0x121   :  { %804 = vmatpush.bf16.msra.mxu2 %v1188_v52  ;;  %v1113_v52 = vld [vmem:[#allocation2 + $0x1a4] sm:$0xf0] }
 0x122   :  { %613 = vmatpush.bf16.msra.mxu0 %v1036_v21 }
 0x123   :  { %818 = vmatpush.bf16.msra.mxu3 %v1180_v29  ;;  %v87_v29 = vperm.slane %v1438_v36, 2 }
 0x125   :  { %805 = vmatpush.bf16.msra.mxu2 %v1176_v25 }
 0x126   :  { %614 = vmatpush.bf16.msra.mxu0 %v1024_v37 }
 0x127   :  { %819 = vmatpush.bf16.msra.mxu3 %v1168_v42 }
 0x129   :  { %806 = vmatpush.bf16.msra.mxu2 %v1164_v41 }
 0x12a   :  { %615 = vmatpush.bf16.msra.mxu0 %v1012_v49 }
 0x12b   :  { %820 = vmatpush.bf16.msra.mxu3 %v1156_v55 }
 0x17b   :  { %v112_v59 = vpop.f32.mrf.mxu0  ;;  %v132_v61 = vpop.f32.mrf.mxu1 }
 0x17c   :  { %v113_v2 = vadd.f32 %v112_v59, %v85_v47  ;;  %v133_v33 = vadd.f32 %v132_v61, %v86_v15  ;;  %v1149_v47 = vld [vmem:[#allocation2 + $0x1ec] sm:$0xf0]  ;;  %v1253_v59 = vld [vmem:[#allocation2 + $0x1cc] sm:$0xf]  ;;  %v1137_v61 = vld [vmem:[#allocation2 + $0x1d4] sm:$0xf0] }
 0x17d   :  { %v1152_v53 = vor.u32 %v1256_v45, %v1149_v47  ;;  %v1140_v63 = vor.u32 %v1253_v59, %v1137_v61  ;;  %v1119_v15 = vld [vmem:[#allocation2 + $0x1a0] sm:$0xf] }
 0x17e   :  { %v364_v13 = vadd.f32 %v335_v57, %v113_v2  ;;  %v1144_v2 = vor.u32 %v1255_v0, %v1143_v62  ;;  %v655_v59 = vld [vmem:[#allocation4 + $0x1b] ss:$8 sm:$0x7]  ;;  %v446_v62 = vld [vmem:[#allocation4 + $0x1a] ss:$8 sm:$0x7] }
 0x17f   :  { %807 = vmatpush.bf16.msra.mxu2 %v1152_v53  ;;  %v448_v0 = vperm.slane %v446_v62, 0 }
 0x180   :  { %v999_v18 = vmul.f32 -1.442695, %v364_v13  ;;  %821 = vmatpush.bf16.msra.mxu3 %v1144_v2  ;;  %v1247_v13 = vld [vmem:[#allocation2 + $0x19c] sm:$0xf] }
 0x182   :  { %1286 = vpow2.f32 %v999_v18  ;;  %v1116_v18 = vor.u32 %v1247_v13, %v1113_v52  ;;  %v658_v13 = vperm.slane %v655_v59, 1 }
 0x183   :  { %v347_v27 = vpop.f32.mrf.mxu0  ;;  %v1445_v28 = vpop.f32.mrf.mxu1  ;;  %808 = vmatpush.bf16.msra.mxu2 %v1140_v63  ;;  %v657_v63 = vperm.slane %v655_v59, 0 }
 0x184   :  { %v348_v34 = vadd.f32 %v347_v27, %v192_v16  ;;  %v1249_v16 = vld [vmem:[#allocation2 + $0x1a8] sm:$0xf0]  ;;  %822 = vmatpush.bf16.msra.mxu3 %v1132_v12  ;;  %v1246_v27 = vld [vmem:[#allocation2 + $0x190] sm:$0xf0]  ;;  %v361_v38 = vadd.f32 %v1445_v28, %v193_v19  ;;  %v449_v12 = vperm.slane %v446_v62, 1 }
 0x185   :  { %v1120_v21 = vor.u32 %v1249_v16, %v1119_v15 }
 0x186   :  { %v384_v46 = vadd.f32 %v348_v34, %v133_v33  ;;  %v152_v33 = vpop.f32.mrf.mxu2  ;;  %v1108_v34 = vor.u32 %v1246_v27, %v1107_v26 }
 0x187   :  { %809 = vmatpush.bf16.msra.mxu2 %v1128_v8  ;;  %v153_v42 = vadd.f32 %v152_v33, %v87_v29 }
 0x188   :  { %v1287_v50 = vpop.eup %1286  ;;  %v1000_v51 = vmul.f32 -1.442695, %v384_v46  ;;  %823 = vmatpush.bf16.msra.mxu3 %v1120_v21 }
 0x189   :  { %v368_v54 = vadd.f32 1.0, %v1287_v50 }
 0x18a   :  { %1288 = vpow2.f32 %v1000_v51 }
 0x18b   :  { %1290 = vrcp.f32 %v368_v54  ;;  %v349_v56 = vpop.f32.mrf.mxu0  ;;  %v362_v57 = vpop.f32.mrf.mxu1  ;;  %v380_v20 = vand.u32 2147483648, %v368_v54  ;;  %v378_v25 = vand.u32 2147483647, %v368_v54  ;;  %vm374_vm5 = vweird.f32 %v368_v54  ;;  %810 = vmatpush.bf16.msra.mxu2 %v1116_v18 }
 0x18c   :  { %824 = vmatpush.bf16.msra.mxu3 %v1108_v34  ;;  %v450_v34 = vperm.slane %v446_v62, 2 }
 0x18d   :  { %v381_v35 = vor.u32 1.1754944e-38, %v380_v20  ;;  %vm379_vm7 = vcmp.eq.f32.partialorder %v378_v25, 8.507059e+37 }
 0x18f   :  { %811 = vmatpush.bf16.msra.mxu2 %v1104_v31  ;;  %v659_v31 = vperm.slane %v655_v59, 2 }
 0x190   :  { %v1289_v7 = vpop.eup %1288 }
 0x191   :  { %v1291_v9 = vpop.eup %1290  ;;  %v388_v10 = vadd.f32 1.0, %v1289_v7 }
 0x192   :  { %v370_v14 = vmul.f32 %v1291_v9, %v368_v54  ;;  %vm375_vm4 = vweird.f32 %v1291_v9 }
 0x193   :  { %1292 = vrcp.f32 %v388_v10  ;;  %vm376_vm6 = vmor %vm374_vm5, %vm375_vm4  ;;  %v400_v44 = vand.u32 2147483648, %v388_v10  ;;  %v398_v47 = vand.u32 2147483647, %v388_v10  ;;  %vm394_vm9 = vweird.f32 %v388_v10 }
 0x194   :  { %v371_v17 = vsub.f32 1.0, %v370_v14  ;;  %vm885_vm4 = vcmask 7168  }
 0x195   :  { %v401_v48 = vor.u32 1.1754944e-38, %v400_v44  ;;  %vm399_vm11 = vcmp.eq.f32.partialorder %v398_v47, 8.507059e+37 }
 0x196   :  { %v372_v24 = vmul.f32 %v1291_v9, %v371_v17 }
 0x198   :  { %v373_v30 = vadd.f32 %v1291_v9, %v372_v24 }
 0x199   :  { %v1293_v32 = vpop.eup %1292 }
 0x19a   :  { %v390_v37 = vmul.f32 %v1293_v32, %v388_v10  ;;  %v377_v39 = vsel %vm376_vm6, %v1291_v9, %v373_v30  ;;  %vm395_vm8 = vweird.f32 %v1293_v32 }
 0x19b   :  { %v382_v40 = vsel %vm379_vm7, %v381_v35, %v377_v39  ;;  %v800_v41 = vpop.f32.mrf.mxu1  ;;  %vm396_vm10 = vmor %vm394_vm9, %vm395_vm8 }
 0x19c   :  { %v391_v43 = vsub.f32 1.0, %v390_v37  ;;  %v404_v36 = vmul.f32 %v382_v40, %v361_v38  ;;  %v801_v3 = vadd.f32 %v800_v41, %v657_v63 }
 0x19e   :  { %v405_v45 = vadd.f32 %v404_v36, %v153_v42  ;;  %v392_v46 = vmul.f32 %v1293_v32, %v391_v43 }
 0x1a0   :  { %1294 = vtanh.f32 %v405_v45  ;;  %v393_v1 = vadd.f32 %v1293_v32, %v392_v46 }
 0x1a2   :  { %v397_v28 = vsel %vm396_vm10, %v1293_v32, %v393_v1 }
 0x1a3   :  { %v802_v49 = vpop.f32.mrf.mxu1  ;;  %v402_v50 = vsel %vm399_vm11, %v401_v48, %v397_v28 }
 0x1a4   :  { %v407_v51 = vsub.f32 1.0, %v402_v50  ;;  %v409_v55 = vmul.f32 %v402_v50, %v1418_v11 }
 0x1a6   :  { %v1295_v53 = vpop.eup %1294 }
 0x1a7   :  { %v408_v54 = vmul.f32 %v1295_v53, %v407_v51  ;;  %v879_v53 = vld [vmem:[#allocation4 + $0x1c] ss:$0 sm:$0xff] }
 0x1a9   :  { %v410_v56 = vadd.f32 %v409_v55, %v408_v54 }
 0x1ab   :  { %411 = vst [vmem:[%s1468_s5] sm:$0xff] %v410_v56  ;;  %v412_v57 = vpack.c.bf16 %v410_v56, %v410_v56  ;;  %v880_v56 = vld [vmem:[#allocation4 + $0x1d] ss:$0 sm:$0xff] }
 0x1ad   :  { %590 = vmatmul.bf16.vlgmr.msrb.gmra.mxu2 %v412_v57  ;;  %603 = vmatmul.bf16.vlgmr.msrb.gmra.mxu3 %v412_v57 }
 0x1ae   :  { %616 = vmatmul.bf16.vlgmr.msra.gmra.mxu0 %v412_v57 }
 0x1bd   :  { %812 = vmatmul.bf16.vlgmr.msra.gmra.mxu2 %v1433_v60  ;;  %825 = vmatmul.bf16.vlgmr.msra.gmra.mxu3 %v1433_v60 }
 0x22b   :  { %v617_v61 = vpop.f32.mrf.mxu0 }
 0x22c   :  { %v618_v40 = vadd.f32 %v617_v61, %v450_v34 }
 0x230   :  { %v591_v2 = vpop.f32.mrf.mxu2  ;;  %v604_v11 = vpop.f32.mrf.mxu3 }
 0x231   :  { %v592_v4 = vadd.f32 %v591_v2, %v448_v0  ;;  %v605_v15 = vadd.f32 %v604_v11, %v449_v12 }
 0x233   :  { %v830_v5 = vadd.f32 %v801_v3, %v592_v4  ;;  %v619_v6 = vpop.f32.mrf.mxu0 }
 0x235   :  { %v1193_v7 = vmul.f32 -1.442695, %v830_v5 }
 0x237   :  { %1296 = vpow2.f32 %v1193_v7 }
 0x238   :  { %v593_v8 = vpop.f32.mrf.mxu2  ;;  %v606_v9 = vpop.f32.mrf.mxu3 }
 0x23d   :  { %v1297_v10 = vpop.eup %1296 }
 0x23e   :  { %v834_v52 = vadd.f32 1.0, %v1297_v10 }
 0x240   :  { %1298 = vrcp.f32 %v834_v52  ;;  %v813_v60 = vpop.f32.mrf.mxu2  ;;  %v826_v14 = vpop.f32.mrf.mxu3  ;;  %v846_v25 = vand.u32 2147483648, %v834_v52  ;;  %v844_v26 = vand.u32 2147483647, %v834_v52  ;;  %vm840_vm13 = vweird.f32 %v834_v52 }
 0x241   :  { %v814_v16 = vadd.f32 %v813_v60, %v658_v13  ;;  %v827_v37 = vadd.f32 %v826_v14, %v659_v31 }
 0x242   :  { %v847_v33 = vor.u32 1.1754944e-38, %v846_v25  ;;  %vm845_vm15 = vcmp.eq.f32.partialorder %v844_v26, 8.507059e+37 }
 0x243   :  { %v850_v17 = vadd.f32 %v814_v16, %v605_v15 }
 0x245   :  { %v1194_v18 = vmul.f32 -1.442695, %v850_v17 }
 0x246   :  { %v1299_v19 = vpop.eup %1298 }
 0x247   :  { %1300 = vpow2.f32 %v1194_v18  ;;  %v836_v20 = vmul.f32 %v1299_v19, %v834_v52  ;;  %vm841_vm12 = vweird.f32 %v1299_v19 }
 0x248   :  { %v815_v21 = vpop.f32.mrf.mxu2  ;;  %v828_v22 = vpop.f32.mrf.mxu3  ;;  %vm842_vm14 = vmor %vm840_vm13, %vm841_vm12 }
 0x249   :  { %v837_v23 = vsub.f32 1.0, %v836_v20 }
 0x24b   :  { %v838_v24 = vmul.f32 %v1299_v19, %v837_v23 }
 0x24d   :  { %v1301_v27 = vpop.eup %1300  ;;  %v839_v29 = vadd.f32 %v1299_v19, %v838_v24 }
 0x24e   :  { %v854_v30 = vadd.f32 1.0, %v1301_v27 }
 0x24f   :  { %v843_v32 = vsel %vm842_vm14, %v1299_v19, %v839_v29 }
 0x250   :  { %1302 = vrcp.f32 %v854_v30  ;;  %v848_v35 = vsel %vm845_vm15, %v847_v33, %v843_v32  ;;  %v866_v36 = vand.u32 2147483648, %v854_v30  ;;  %v864_v45 = vand.u32 2147483647, %v854_v30 }
 0x251   :  { %v870_v38 = vmul.f32 %v848_v35, %v827_v37  ;;  %vm860_vm1 = vweird.f32 %v854_v30 }
 0x252   :  { %v867_v47 = vor.u32 1.1754944e-38, %v866_v36  ;;  %vm865_vm3 = vcmp.eq.f32.partialorder %v864_v45, 8.507059e+37 }
 0x253   :  { %v871_v42 = vadd.f32 %v870_v38, %v618_v40 }
 0x255   :  { %1304 = vtanh.f32 %v871_v42 }
 0x256   :  { %v1303_v39 = vpop.eup %1302 }
 0x257   :  { %v856_v41 = vmul.f32 %v1303_v39, %v854_v30  ;;  %vm861_vm0 = vweird.f32 %v1303_v39 }
 0x258   :  { %vm862_vm2 = vmor %vm860_vm1, %vm861_vm0 }
 0x259   :  { %v857_v43 = vsub.f32 1.0, %v856_v41 }
 0x25b   :  { %v858_v44 = vmul.f32 %v1303_v39, %v857_v43  ;;  %v1305_v49 = vpop.eup %1304 }
 0x25d   :  { %v859_v46 = vadd.f32 %v1303_v39, %v858_v44 }
 0x25f   :  { %v863_v1 = vsel %vm862_vm2, %v1303_v39, %v859_v46 }
 0x260   :  { %v868_v48 = vsel %vm865_vm3, %v867_v47, %v863_v1 }
 0x261   :  { %v873_v28 = vsub.f32 1.0, %v868_v48  ;;  %v875_v51 = vmul.f32 %v868_v48, %v1429_v58 }
 0x263   :  { %v874_v50 = vmul.f32 %v1305_v49, %v873_v28 }
 0x265   :  { %v876_v54 = vadd.f32 %v875_v51, %v874_v50 }
 0x267   :  { %v881_v55 = vmul.f32 %v879_v53, %v876_v54  ;;  %1195 = vst [vmem:[%s1468_s5 + $0x8] sm:$0xff] %v876_v54 }
 0x269   :  { %882 = vadd.xlane.f32.xlu1 %v881_v55 }
 0x2dc   :  { %v883_v57 = vpop.xlane.xlu1 %882 }
 0x2dd   :  { %v884_v59 = vadd.f32 %v883_v57, %v880_v56 }
 0x2df   :  { %886 = vst.msk [vmem:[%s1467_s4] sm:$0xff] %vm885_vm4, %v884_v59 }
 0x2e0   :  { %895 = vsyncpa [#allocation3], 1 }
 0x2e1   :  { %896 = vsyncpa [#allocation5], 1 }

</bundles_post_ra>
